<compile_context>
chip_gen: v5e
topology: v5e:2x2
jax: 0.10.0
libtpu: 0.0.40
codegen_flags: <defaults>
</compile_context>

<pallas_src>
import functools

import jax
import jax.numpy as jnp
from jax.experimental import pallas as pl
from jax.experimental.pallas import tpu as pltpu

_LANE = 128


def _round_up(n, m):
    return ((n + m - 1) // m) * m


def _vmem_capacity_bytes():
    """Physical VMEM capacity; conservative fallback = v7x (64 MiB)."""
    try:
        return int(pltpu.get_tpu_info().vmem_capacity_bytes)
    except Exception:
        return 64 * 1024 * 1024


def classifier_kernel(x_ref, w_ref, b_ref, o_ref, *, mxu_dtype):
    # TODO(synk): dropout has no defined rate in the module (self.dropout is
    # never constructed); treated as identity (inference behavior).
    x = x_ref[...].astype(jnp.float32)                                # (TB, H)

    x_min = jnp.min(x, axis=-1, keepdims=True)                        # (TB, 1)
    x_max = jnp.max(x, axis=-1, keepdims=True)                        # (TB, 1)
    # approx reciprocal runs on the EUP (separate bundle slot).
    # NOTE: a constant row (max == min) yields Inf/NaN, matching the PyTorch
    # reference's divide-by-zero behavior.
    inv_range = pl.reciprocal(x_max - x_min, approx=True)             # (TB, 1)

    # Normalize in f32 BEFORE the matmul (HBM-bound: this VPU pass is free),
    # then feed the MXU bf16 operands with f32 accumulation.
    x_norm = ((x - x_min) * inv_range).astype(mxu_dtype)              # (TB, H)
    logits = jnp.dot(x_norm, w_ref[...],
                     preferred_element_type=jnp.float32)              # (TB, Lp)
    logits = logits + b_ref[...]                                      # f32 bias
    o_ref[...] = logits.astype(o_ref.dtype)


def prepare_classifier_params(weight, bias, *, mxu_dtype=jnp.bfloat16):
    """One-time parameter prep (outside the hot path).

    weight: (num_labels, hidden) PyTorch layout; bias: (num_labels,)
    Returns lane-padded (hidden, Lp) weight in mxu_dtype and (1, Lp) f32 bias.
    """
    L, H = weight.shape
    Lp = _round_up(L, _LANE)
    w_t = jnp.zeros((H, Lp), mxu_dtype).at[:, :L].set(
        weight.T.astype(mxu_dtype))
    b_p = jnp.zeros((1, Lp), jnp.float32).at[0, :L].set(
        bias.astype(jnp.float32))
    return w_t, b_p


def _pick_block_rows(B, H, Lp, x_bytes, w_bytes, out_bytes, block_rows,
                     vmem_budget):
    """Pick a batch tile that (a) fits the VMEM budget with double buffering
    and (b) gives >= 2 grid steps where possible (v7x has 2 TensorCores)."""
    TB = min(_round_up(block_rows, 8), _round_up(B, 8))
    if B > 8:
        TB = min(TB, _round_up(pl.cdiv(B, 2), 8))
    fixed = H * Lp * w_bytes + 2 * Lp * 4          # resident W + bias
    while TB > 8:
        per_tile = (2 * TB * H * x_bytes           # x double buffer
                    + 2 * TB * Lp * out_bytes      # out double buffer
                    + TB * H * (4 + 2)             # f32 upcast + bf16 norm temps
                    + TB * Lp * 4)                 # f32 logits temp
        if fixed + per_tile <= vmem_budget:
            break
        TB = max(_round_up(TB // 2, 8), 8)
    return TB


def classifier_forward(x, w_t_pad, b_pad, *, block_rows=1024, out_dtype=None):
    """x: (B, H) activations (f32 or bf16 — bf16 halves the dominant HBM
    traffic if the producer allows).  Returns LANE-PADDED logits (B, Lp);
    slice [:, :num_labels] (or fuse the mask) at the consumer."""
    B, H = x.shape
    Lp = w_t_pad.shape[1]
    out_dtype = x.dtype if out_dtype is None else out_dtype

    x_bytes = jnp.dtype(x.dtype).itemsize
    w_bytes = jnp.dtype(w_t_pad.dtype).itemsize
    out_bytes = jnp.dtype(out_dtype).itemsize

    vmem_cap = _vmem_capacity_bytes()
    vmem_budget = int(vmem_cap * 0.65)             # tile-sizing budget
    vmem_limit = max(32 * 1024 * 1024,
                     min(int(vmem_cap * 0.75), 100 * 1024 * 1024))

    TB = _pick_block_rows(B, H, Lp, x_bytes, w_bytes, out_bytes,
                          block_rows, vmem_budget)

    kernel = functools.partial(classifier_kernel, mxu_dtype=w_t_pad.dtype)

    out = pl.pallas_call(
        kernel,
        out_shape=jax.ShapeDtypeStruct((B, Lp), out_dtype),
        grid_spec=pltpu.PrefetchScalarGridSpec(
            num_scalar_prefetch=0,
            grid=(pl.cdiv(B, TB),),                # ragged last block is masked
            in_specs=[
                pl.BlockSpec((TB, H), lambda i: (i, 0)),   # x: streamed
                pl.BlockSpec((H, Lp), lambda i: (0, 0)),   # W: VMEM-resident
                pl.BlockSpec((1, Lp), lambda i: (0, 0)),   # bias
            ],
            out_specs=pl.BlockSpec((TB, Lp), lambda i: (i, 0)),
        ),
        compiler_params=pltpu.CompilerParams(
            dimension_semantics=("parallel",),
            vmem_limit_bytes=vmem_limit,
        ),
    )(x, w_t_pad, b_pad)

    return out                                     # (B, Lp) lane-padded


if __name__ == "__main__":
    # Small shapes implied by the module: pooled_output (batch, hidden_size),
    # classifier: hidden_size -> num_labels.
    # NOTE: at this demo scale the pallas_call is pure launch/DMA overhead;
    # the kernel pays off once B*H is large enough to be HBM-bound.
    batch, hidden_size, num_labels = 8, 32, 4

    key = jax.random.PRNGKey(0)
    kx, kw, kb = jax.random.split(key, 3)

    x = jax.random.normal(kx, (batch, hidden_size), dtype=jnp.float32)
    # Deterministic nn.Linear-style parameters (synthetic, not a checkpoint).
    bound = 1.0 / (hidden_size ** 0.5)
    weight = jax.random.uniform(kw, (num_labels, hidden_size),
                                minval=-bound, maxval=bound, dtype=jnp.float32)
    bias = jax.random.uniform(kb, (num_labels,),
                              minval=-bound, maxval=bound, dtype=jnp.float32)

    w_t_pad, b_pad = prepare_classifier_params(weight, bias)
    logits_padded = classifier_forward(x, w_t_pad, b_pad)
    jax.block_until_ready(logits_padded)

    # Consumer-side slice of the true labels (kernel output stays lane-dense).
    logits = logits_padded[:, :num_labels]

    # Cross-check against a pure-JAX f32 reference.  Tolerance accounts for
    # bf16 MXU operands (f32 accumulate) and the approx EUP reciprocal.
    xm = (x - x.min(-1, keepdims=True)) / (
        x.max(-1, keepdims=True) - x.min(-1, keepdims=True))
    ref = xm @ weight.T + bias
    assert logits.shape == ref.shape
    assert jnp.allclose(logits, ref, atol=5e-2, rtol=5e-2), "mismatch vs reference"

    print("KERNEL_OK")
</pallas_src>

<mosaic_0001>
module attributes {stable_mosaic.version = 11 : i64} {
  func.func @classifier_kernel(%arg0: i32, %arg1: memref<8x32xf32, #tpu.memory_space<vmem>>, %arg2: memref<32x128xbf16, #tpu.memory_space<vmem>>, %arg3: memref<1x128xf32, #tpu.memory_space<vmem>>, %arg4: memref<8x128xf32, #tpu.memory_space<vmem>>) attributes {dimension_semantics = [#tpu.dimension_semantics<parallel>], iteration_bounds = array<i64: 1>, scalar_prefetch = 0 : i64, scratch_operands = 0 : i64, tpu.core_type = #tpu.core_type<tc>, window_params = [{transform_indices = @transform_0, window_bounds = array<i64: 8, 32>}, {pipeline_mode = #tpu.pipeline_mode<synchronous>, transform_indices = @transform_1, window_bounds = array<i64: 32, 128>}, {pipeline_mode = #tpu.pipeline_mode<synchronous>, transform_indices = @transform_2, window_bounds = array<i64: 1, 128>}, {transform_indices = @transform_3, window_bounds = array<i64: 8, 128>}]} {
    %c0 = arith.constant 0 : index
    %c0_0 = arith.constant 0 : index
    %0 = vector.load %arg1[%c0, %c0_0] : memref<8x32xf32, #tpu.memory_space<vmem>>, vector<8x32xf32>
    %cst = arith.constant dense<0x7F800000> : vector<8xf32>
    %1 = vector.multi_reduction <minimumf>, %0, %cst [1] : vector<8x32xf32> to vector<8xf32>
    %2 = vector.shape_cast %1 : vector<8xf32> to vector<8x1xf32>
    %cst_1 = arith.constant dense<0xFF800000> : vector<8xf32>
    %3 = vector.multi_reduction <maximumf>, %0, %cst_1 [1] : vector<8x32xf32> to vector<8xf32>
    %4 = vector.shape_cast %3 : vector<8xf32> to vector<8x1xf32>
    %5 = arith.subf %4, %2 : vector<8x1xf32>
    %6 = tpu.reciprocal %5 {approx = true} : vector<8x1xf32> -> vector<8x1xf32>
    %7 = vector.broadcast %2 : vector<8x1xf32> to vector<8x32xf32>
    %8 = arith.subf %0, %7 : vector<8x32xf32>
    %9 = vector.broadcast %6 : vector<8x1xf32> to vector<8x32xf32>
    %10 = arith.mulf %8, %9 : vector<8x32xf32>
    %11 = arith.truncf %10 : vector<8x32xf32> to vector<8x32xbf16>
    %c0_2 = arith.constant 0 : index
    %c0_3 = arith.constant 0 : index
    %12 = vector.load %arg2[%c0_2, %c0_3] : memref<32x128xbf16, #tpu.memory_space<vmem>>, vector<32x128xbf16>
    %cst_4 = arith.constant dense<0.000000e+00> : vector<8x128xf32>
    %13 = tpu.matmul %11, %12, %cst_4 {dimension_numbers = #tpu.dot_dimension_numbers<[1], [0], [0], [1], [0, 0, 1, 1], [], []>} : vector<8x32xbf16>, vector<32x128xbf16>, vector<8x128xf32> -> vector<8x128xf32>
    %c0_5 = arith.constant 0 : index
    %c0_6 = arith.constant 0 : index
    %14 = vector.load %arg3[%c0_5, %c0_6] : memref<1x128xf32, #tpu.memory_space<vmem>>, vector<1x128xf32>
    %15 = vector.broadcast %14 : vector<1x128xf32> to vector<8x128xf32>
    %16 = arith.addf %13, %15 : vector<8x128xf32>
    %c0_7 = arith.constant 0 : index
    %c0_8 = arith.constant 0 : index
    %17 = vector.load %arg4[%c0_7, %c0_8] : memref<8x128xf32, #tpu.memory_space<vmem>>, vector<8x128xf32>
    tpu.vector_store %arg4[%c0_7, %c0_8], %16 {strides = array<i32>} : memref<8x128xf32, #tpu.memory_space<vmem>>, vector<8x128xf32>,
    return
  }
  func.func @transform_0(%arg0: i32) -> (i32, i32) {
    %c0_i32 = arith.constant 0 : i32
    %c0_i32_0 = arith.constant 0 : i32
    return %arg0, %c0_i32 : i32, i32
  }
  func.func @transform_1(%arg0: i32) -> (i32, i32) {
    %c0_i32 = arith.constant 0 : i32
    %c0_i32_0 = arith.constant 0 : i32
    %c0_i32_1 = arith.constant 0 : i32
    return %c0_i32, %c0_i32_0 : i32, i32
  }
  func.func @transform_2(%arg0: i32) -> (i32, i32) {
    %c0_i32 = arith.constant 0 : i32
    %c0_i32_0 = arith.constant 0 : i32
    %c0_i32_1 = arith.constant 0 : i32
    return %c0_i32, %c0_i32_0 : i32, i32
  }
  func.func @transform_3(%arg0: i32) -> (i32, i32) {
    %c0_i32 = arith.constant 0 : i32
    %c0_i32_0 = arith.constant 0 : i32
    return %arg0, %c0_i32 : i32, i32
  }
}

</mosaic_0001>

<bundles_post_ra>
// kernel: tpu_custom_call.1
= control target key start
LH: loop header
LB: loop body
LE: loop exit
PB: predicated region body
PF: predicated region fallthrough
CT: control target
= control target key end

     0   :  { %8 = vsyncpa [#allocation3], 0  ;;  %s251_s0 = inlined_call_operand.hbm [shape: f32[8,32], index: 0, kind: input, shape index: {}]   ;;  %s252_s1 = inlined_call_operand.hbm [shape: bf16[32,128], index: 1, kind: input, shape index: {}]   ;;  %s253_s2 = inlined_call_operand.vmem [shape: f32[1,128], index: 2, kind: input, shape index: {}]   ;;  %s254_s3 = inlined_call_operand.hbm [shape: f32[8,128], index: 3, kind: output, shape index: {}]  }
   0x1   :  { %9 = vsyncpa [#allocation6], 0 }
   0x2   :  { %10 = vsyncpa [#allocation4], 0  ;;  %s16_s14 = sshll.u32 %s251_s0, 4  ;;  %s211_s15 = smov [#allocation2]   ;;  %s17_s14 = int_to_ptr.hbm [resolvable:$true] %s16_s14 }
   0x3   :  { %s18_s16 = sshll.u32 %s211_s15, 4  ;;  %s26_s19 = sshll.u32 %s252_s1, 4  ;;  %s19_s16 = int_to_ptr.vmem [resolvable:$true] %s18_s16  ;;  %s27_s19 = int_to_ptr.hbm [resolvable:$true] %s26_s19 }
   0x4   :  { %21 = dma.hbm_to_vmem [thread:$0]  %s17_s14, 128, %s19_s16, [#allocation3]  }
   0x5   :  { %s212_s20 = smov [#allocation5]   ;;  %s213_s22 = smov 64  }
   0x6   :  { %s28_s21 = sshll.u32 %s212_s20, 4  ;;  %s214_s23 = smov 4   ;;  %s29_s21 = int_to_ptr.vmem [resolvable:$true] %s28_s21 }
   0x7   :  { %34 = dma.hbm_to_vmem [thread:$0]  %s27_s19, 256, %s29_s21, [#allocation6], %s213_s22, %s213_s22, %s214_s23  }
   0x8   :  { %205 = dma.done.wait [#allocation3], 128  }
   0x9   :  { %206 = vsyncadd [#allocation3], 4294967168 }
   0xa   :  { %207 = dma.done.wait [#allocation6], 256  }
   0xb   :  { %208 = vsyncadd [#allocation6], 4294967040  ;;  %vm47_vm0 = vcmask 261120   ;;  %v46_v0 = vld [vmem:[#allocation2] sm:$0xff]  ;;  %v124_v3 = vld [vmem:[#allocation5 + $0x8] sm:$0xff]  ;;  %s215_s24 = smov [#allocation7]  }
   0xc   :  { %v48_v1 = vsel %vm47_vm0, %v46_v0, inf  ;;  %v51_v2 = vsel %vm47_vm0, %v46_v0, -inf  ;;  %88 = vmatpush.bf16.msra.mxu0 %v124_v3  ;;  %v123_v4 = vld [vmem:[#allocation5] sm:$0xff]  ;;  %v130_v12 = vld [vmem:[%s253_s2] ss:$0 sm:$0xff]  ;;  %s101_s25 = sshll.u32 %s215_s24, 4  ;;  %s102_s25 = int_to_ptr.vmem [resolvable:$true] %s101_s25 }
   0xd   :  { %49 = vmin.xlane.f32.xlu0 %v48_v1  ;;  %s103_s28 = sshll.u32 %s254_s3, 4  ;;  %s104_s28 = int_to_ptr.hbm [resolvable:$true] %s103_s28 }
  0x10   :  { %89 = vmatpush.bf16.msra.mxu0 %v123_v4 }
  0x15   :  { %52 = vmax.xlane.f32.xlu0 %v51_v2 }
  0x80   :  { %v50_v5 = vpop.xlane.xlu0 %49 }
  0x81   :  { %v56_v8 = vsub.f32 %v46_v0, %v50_v5 }
  0x88   :  { %v53_v6 = vpop.xlane.xlu0 %52 }
  0x89   :  { %v54_v7 = vsub.f32 %v53_v6, %v50_v5 }
  0x8b   :  { %131 = vrcp.f32 %v54_v7 }
  0x91   :  { %v132_v9 = vpop.eup %131 }
  0x92   :  { %v57_v10 = vmul.f32 %v132_v9, %v56_v8 }
  0x94   :  { %v58_v11 = vpack.c.bf16 %v57_v10, %v57_v10 }
  0x96   :  { %122 = vmatmul.msk.bf16.vlgmr.msra.gmra.mxu0 %vm47_vm0, %v58_v11 }
 0x113   :  { %v91_v13 = vpop.f32.mrf.mxu0 }
 0x114   :  { %v92_v14 = vadd.f32 %v130_v12, %v91_v13 }
 0x116   :  { %95 = vst [vmem:[#allocation7] sm:$0xff] %v92_v14 }
 0x117   :  { %106 = dma.vmem_to_hbm [thread:$0]  %s102_s25, 128, %s104_s28, [#allocation4]  }
 0x11b   :  { %v93_v15 = vpop.f32.mrf.mxu0 }
 0x11c   :  { %209 = dma.done.wait [#allocation4], 128  }
 0x11d   :  { %210 = vsyncadd [#allocation4], 4294967168 }
 0x11e   :  { %111 = vsyncpa [#allocation3], 1 }
 0x11f   :  { %112 = vsyncpa [#allocation6], 1 }
 0x120   :  { %113 = vsyncpa [#allocation4], 1 }

</bundles_post_ra>
